<compile_context>
chip_gen: v7x
topology: tpu7x:2x2x1
jax: 0.10.0
libtpu: 0.0.40
codegen_flags: <defaults>
</compile_context>

<pallas_src>
import functools

import jax
import jax.numpy as jnp
import numpy as np
from jax.experimental import pallas as pl
from jax.experimental.pallas import tpu as pltpu


def _sem_str_attention_kernel(x_ref, adj_ref, wtp_ref, btp_ref,
                              wfz_ref, bfz_ref, o_ref, *, batch, tokens):
    """x_ref: (B*T, D), adj_ref: (B, T, T), o_ref: (B*T, M); all f32 in VMEM."""
    eps = jnp.float32(0.005)

    # tp = tanh(Linear(D -> S)(x)); batch folded into the MXU row dimension.
    tp = jnp.tanh(
        jnp.dot(x_ref[...], wtp_ref[...], preferred_element_type=jnp.float32)
        + btp_ref[...]
    )                                                         # (B*T, S)

    # Per-batch attended hidden. B is tiny and static -> unrolled Python loop.
    att_blocks = []
    for b in range(batch):
        adj_b = adj_ref[b]                                    # (T, T) raw adjacency
        tp_b = tp[b * tokens:(b + 1) * tokens, :]             # (T, S) static slice
        # (adj_b + eps) @ tp_b == adj_b @ tp_b + eps * colsum(tp_b)
        raw = jnp.dot(adj_b, tp_b, preferred_element_type=jnp.float32)   # (T, S)
        col = jnp.sum(tp_b, axis=0, keepdims=True)            # (1, S)
        # rowsum(adj_b + eps) == rowsum(adj_b) + eps * T
        denom = jnp.sum(adj_b, axis=1, keepdims=True) + eps * tokens     # (T, 1)
        inv = pl.reciprocal(denom, approx=False)              # exact, EUP path
        att_blocks.append((raw + eps * col) * inv)            # (T, S)
    att = jnp.concatenate(att_blocks, axis=0)                 # (B*T, S)

    # out = relu(Linear(S -> M)(att))
    out = jnp.dot(att, wfz_ref[...], preferred_element_type=jnp.float32)
    o_ref[...] = jnp.maximum(out + bfz_ref[...], 0.0)


def semantic_str_attention(x, adj_mat, w_tp, b_tp, w_fz, b_fz):
    """x: (B,T,D), adj_mat: (B,T,T), w_tp: (D,S), b_tp: (1,S), w_fz: (S,M), b_fz: (1,M)."""
    B, T, D = x.shape
    S = w_tp.shape[1]   # str_dim_size
    M = w_fz.shape[1]   # sem_dim_size

    x2d = x.reshape(B * T, D)   # wrapper-side reshape: fold batch into matmul rows

    vmem = pltpu.MemorySpace.VMEM
    out2d = pl.pallas_call(
        functools.partial(_sem_str_attention_kernel, batch=B, tokens=T),
        out_shape=jax.ShapeDtypeStruct((B * T, M), jnp.float32),
        in_specs=[pl.BlockSpec(memory_space=vmem)] * 6,   # full arrays, no grid
        out_specs=pl.BlockSpec(memory_space=vmem),
    )(x2d, adj_mat, w_tp, b_tp, w_fz, b_fz)

    return out2d.reshape(B, T, M)


def _xavier_uniform(key, fan_in, fan_out):
    # matches torch.nn.init.xavier_uniform_ distribution (gain=1)
    limit = float(np.sqrt(6.0 / (fan_in + fan_out)))
    return jax.random.uniform(key, (fan_in, fan_out), jnp.float32,
                              minval=-limit, maxval=limit)


def reference_forward(x, adj_mat, w_tp, b_tp, w_fz, b_fz):
    adj = adj_mat + 0.005
    adj = adj / jnp.sum(adj, axis=2, keepdims=True)
    tp = jnp.tanh(jnp.einsum("btd,ds->bts", x, w_tp) + b_tp)
    att = jnp.einsum("btk,bks->bts", adj, tp)
    return jax.nn.relu(jnp.einsum("bts,sm->btm", att, w_fz) + b_fz)


if __name__ == "__main__":
    # Module hyper-params (synthetic, deterministic init):
    sent_hidden_size = 32   # D
    sem_dim_size = 16       # M  -> str_dim = D - M = 16
    str_dim_size = sent_hidden_size - sem_dim_size
    batch, tokens = 2, 8

    key = jax.random.PRNGKey(0)
    k_x, k_adj, k_w1, k_w2 = jax.random.split(key, 4)

    x = jax.random.normal(k_x, (batch, tokens, sent_hidden_size), jnp.float32)
    adj_mat = jax.random.uniform(k_adj, (batch, tokens, tokens), jnp.float32)

    # Parameters: xavier-uniform weights, zero biases (as in the module __init__).
    w_tp = _xavier_uniform(k_w1, sent_hidden_size, str_dim_size)   # (D, S)
    b_tp = jnp.zeros((1, str_dim_size), jnp.float32)
    w_fz = _xavier_uniform(k_w2, str_dim_size, sem_dim_size)       # (S, M)
    b_fz = jnp.zeros((1, sem_dim_size), jnp.float32)

    out = jax.block_until_ready(
        semantic_str_attention(x, adj_mat, w_tp, b_tp, w_fz, b_fz))

    ref = reference_forward(x, adj_mat, w_tp, b_tp, w_fz, b_fz)
    np.testing.assert_allclose(np.asarray(out), np.asarray(ref),
                               rtol=1e-5, atol=2e-5)

    print("KERNEL_OK")
</pallas_src>

<mosaic_0001>
module attributes {stable_mosaic.version = 11 : i64} {
  func.func @_sem_str_attention_kernel(%arg0: memref<16x32xf32, #tpu.memory_space<vmem>>, %arg1: memref<2x8x8xf32, #tpu.memory_space<vmem>>, %arg2: memref<32x16xf32, #tpu.memory_space<vmem>>, %arg3: memref<1x16xf32, #tpu.memory_space<vmem>>, %arg4: memref<16x16xf32, #tpu.memory_space<vmem>>, %arg5: memref<1x16xf32, #tpu.memory_space<vmem>>, %arg6: memref<16x16xf32, #tpu.memory_space<vmem>>) attributes {dimension_semantics = [], scalar_prefetch = 0 : i64, scratch_operands = 0 : i64, tpu.core_type = #tpu.core_type<tc>} {
    %c0 = arith.constant 0 : index
    %c0_0 = arith.constant 0 : index
    %0 = vector.load %arg0[%c0, %c0_0] : memref<16x32xf32, #tpu.memory_space<vmem>>, vector<16x32xf32>
    %c0_1 = arith.constant 0 : index
    %c0_2 = arith.constant 0 : index
    %1 = vector.load %arg2[%c0_1, %c0_2] : memref<32x16xf32, #tpu.memory_space<vmem>>, vector<32x16xf32>
    %cst = arith.constant dense<0.000000e+00> : vector<16x16xf32>
    %2 = tpu.matmul %0, %1, %cst {dimension_numbers = #tpu.dot_dimension_numbers<[1], [0], [0], [1], [0, 0, 1, 1], [], []>} : vector<16x32xf32>, vector<32x16xf32>, vector<16x16xf32> -> vector<16x16xf32>
    %c0_3 = arith.constant 0 : index
    %c0_4 = arith.constant 0 : index
    %3 = vector.load %arg3[%c0_3, %c0_4] : memref<1x16xf32, #tpu.memory_space<vmem>>, vector<1x16xf32>
    %4 = vector.broadcast %3 : vector<1x16xf32> to vector<16x16xf32>
    %5 = arith.addf %2, %4 : vector<16x16xf32>
    %6 = math.tanh %5 : vector<16x16xf32>
    %c0_5 = arith.constant 0 : index
    %c0_6 = arith.constant 0 : index
    %c0_7 = arith.constant 0 : index
    %7 = vector.load %arg1[%c0_5, %c0_6, %c0_7] : memref<2x8x8xf32, #tpu.memory_space<vmem>>, vector<1x8x8xf32>
    %8 = vector.shape_cast %7 : vector<1x8x8xf32> to vector<8x8xf32>
    %9 = vector.extract_strided_slice %6 {offsets = [0, 0], sizes = [8, 16], strides = [1, 1]} : vector<16x16xf32> to vector<8x16xf32>
    %cst_8 = arith.constant dense<0.000000e+00> : vector<8x16xf32>
    %10 = tpu.matmul %8, %9, %cst_8 {dimension_numbers = #tpu.dot_dimension_numbers<[1], [0], [0], [1], [0, 0, 1, 1], [], []>} : vector<8x8xf32>, vector<8x16xf32>, vector<8x16xf32> -> vector<8x16xf32>
    %cst_9 = arith.constant dense<0.000000e+00> : vector<16xf32>
    %11 = vector.multi_reduction <add>, %9, %cst_9 [0] : vector<8x16xf32> to vector<16xf32>
    %12 = vector.shape_cast %11 : vector<16xf32> to vector<1x16xf32>
    %cst_10 = arith.constant dense<0.000000e+00> : vector<8xf32>
    %13 = vector.multi_reduction <add>, %8, %cst_10 [1] : vector<8x8xf32> to vector<8xf32>
    %14 = vector.shape_cast %13 : vector<8xf32> to vector<8x1xf32>
    %cst_11 = arith.constant 5.000000e-03 : f32
    %cst_12 = arith.constant 8.000000e+00 : f32
    %15 = arith.mulf %cst_11, %cst_12 : f32
    %16 = vector.broadcast %15 : f32 to vector<8x1xf32>
    %17 = arith.addf %14, %16 : vector<8x1xf32>
    %18 = tpu.reciprocal %17 : vector<8x1xf32> -> vector<8x1xf32>
    %cst_13 = arith.constant 5.000000e-03 : f32
    %19 = vector.broadcast %cst_13 : f32 to vector<1x16xf32>
    %20 = arith.mulf %19, %12 : vector<1x16xf32>
    %21 = vector.broadcast %20 : vector<1x16xf32> to vector<8x16xf32>
    %22 = arith.addf %10, %21 : vector<8x16xf32>
    %23 = vector.broadcast %18 : vector<8x1xf32> to vector<8x16xf32>
    %24 = arith.mulf %22, %23 : vector<8x16xf32>
    %c1 = arith.constant 1 : index
    %c0_14 = arith.constant 0 : index
    %c0_15 = arith.constant 0 : index
    %25 = vector.load %arg1[%c1, %c0_14, %c0_15] : memref<2x8x8xf32, #tpu.memory_space<vmem>>, vector<1x8x8xf32>
    %26 = vector.shape_cast %25 : vector<1x8x8xf32> to vector<8x8xf32>
    %27 = vector.extract_strided_slice %6 {offsets = [8, 0], sizes = [8, 16], strides = [1, 1]} : vector<16x16xf32> to vector<8x16xf32>
    %cst_16 = arith.constant dense<0.000000e+00> : vector<8x16xf32>
    %28 = tpu.matmul %26, %27, %cst_16 {dimension_numbers = #tpu.dot_dimension_numbers<[1], [0], [0], [1], [0, 0, 1, 1], [], []>} : vector<8x8xf32>, vector<8x16xf32>, vector<8x16xf32> -> vector<8x16xf32>
    %cst_17 = arith.constant dense<0.000000e+00> : vector<16xf32>
    %29 = vector.multi_reduction <add>, %27, %cst_17 [0] : vector<8x16xf32> to vector<16xf32>
    %30 = vector.shape_cast %29 : vector<16xf32> to vector<1x16xf32>
    %cst_18 = arith.constant dense<0.000000e+00> : vector<8xf32>
    %31 = vector.multi_reduction <add>, %26, %cst_18 [1] : vector<8x8xf32> to vector<8xf32>
    %32 = vector.shape_cast %31 : vector<8xf32> to vector<8x1xf32>
    %cst_19 = arith.constant 5.000000e-03 : f32
    %cst_20 = arith.constant 8.000000e+00 : f32
    %33 = arith.mulf %cst_19, %cst_20 : f32
    %34 = vector.broadcast %33 : f32 to vector<8x1xf32>
    %35 = arith.addf %32, %34 : vector<8x1xf32>
    %36 = tpu.reciprocal %35 : vector<8x1xf32> -> vector<8x1xf32>
    %cst_21 = arith.constant 5.000000e-03 : f32
    %37 = vector.broadcast %cst_21 : f32 to vector<1x16xf32>
    %38 = arith.mulf %37, %30 : vector<1x16xf32>
    %39 = vector.broadcast %38 : vector<1x16xf32> to vector<8x16xf32>
    %40 = arith.addf %28, %39 : vector<8x16xf32>
    %41 = vector.broadcast %36 : vector<8x1xf32> to vector<8x16xf32>
    %42 = arith.mulf %40, %41 : vector<8x16xf32>
    %43 = tpu.concatenate %24, %42 in 0 : vector<8x16xf32>, vector<8x16xf32> -> vector<16x16xf32>
    %c0_22 = arith.constant 0 : index
    %c0_23 = arith.constant 0 : index
    %44 = vector.load %arg4[%c0_22, %c0_23] : memref<16x16xf32, #tpu.memory_space<vmem>>, vector<16x16xf32>
    %cst_24 = arith.constant dense<0.000000e+00> : vector<16x16xf32>
    %45 = tpu.matmul %43, %44, %cst_24 {dimension_numbers = #tpu.dot_dimension_numbers<[1], [0], [0], [1], [0, 0, 1, 1], [], []>} : vector<16x16xf32>, vector<16x16xf32>, vector<16x16xf32> -> vector<16x16xf32>
    %c0_25 = arith.constant 0 : index
    %c0_26 = arith.constant 0 : index
    %46 = vector.load %arg5[%c0_25, %c0_26] : memref<1x16xf32, #tpu.memory_space<vmem>>, vector<1x16xf32>
    %47 = vector.broadcast %46 : vector<1x16xf32> to vector<16x16xf32>
    %48 = arith.addf %45, %47 : vector<16x16xf32>
    %cst_27 = arith.constant 0.000000e+00 : f32
    %49 = vector.broadcast %cst_27 : f32 to vector<16x16xf32>
    %50 = arith.maximumf %48, %49 : vector<16x16xf32>
    %c0_28 = arith.constant 0 : index
    %c0_29 = arith.constant 0 : index
    %51 = vector.load %arg6[%c0_28, %c0_29] : memref<16x16xf32, #tpu.memory_space<vmem>>, vector<16x16xf32>
    tpu.vector_store %arg6[%c0_28, %c0_29], %50 {strides = array<i32>} : memref<16x16xf32, #tpu.memory_space<vmem>>, vector<16x16xf32>,
    return
  }
}

</mosaic_0001>

<bundles_post_ra>
// kernel: tpu_custom_call.1
= control target key start
LH: loop header
LB: loop body
LE: loop exit
PB: predicated region body
PF: predicated region fallthrough
CT: control target
= control target key end

     0   :  { %vm37_vm0 = vcmask 261120   ;;  %s610_s0 = inlined_call_operand.vmem [shape: f32[16,32], index: 0, kind: input, shape index: {}]   ;;  %s611_s1 = inlined_call_operand.vmem [shape: f32[2,8,8], index: 1, kind: input, shape index: {}]   ;;  %s612_s2 = inlined_call_operand.vmem [shape: f32[32,16], index: 2, kind: input, shape index: {}]   ;;  %s613_s3 = inlined_call_operand.vmem [shape: f32[1,16], index: 3, kind: input, shape index: {}]   ;;  %s614_s4 = inlined_call_operand.vmem [shape: f32[16,16], index: 4, kind: input, shape index: {}]   ;;  %s615_s5 = inlined_call_operand.vmem [shape: f32[1,16], index: 5, kind: input, shape index: {}]   ;;  %s616_s6 = inlined_call_operand.hbm [shape: f32[16,16], index: 6, kind: output, shape index: {}]  }
   0x1   :  { %v26_v0 = vld [vmem:[%s612_s2] sm:$0xff]  ;;  %v27_v1 = vld [vmem:[%s612_s2 + $0x8] sm:$0xff]  ;;  %v28_v2 = vld [vmem:[%s612_s2 + $0x10] sm:$0xff] }
   0x2   :  { %v461_v3 = vpack.c.bf16 %v27_v1, %v26_v0  ;;  %v29_v4 = vld [vmem:[%s612_s2 + $0x18] sm:$0xff]  ;;  %v24_v5 = vld [vmem:[%s610_s0] sm:$0xff] }
   0x3   :  { %v465_v6 = vpack.c.bf16 %v29_v4, %v28_v2  ;;  %441 = vmatprep.mubr.msk.f32.mxu0 %vm37_vm0, %v24_v5 }
   0x4   :  { %11 = vsyncpa [#allocation3], 0  ;;  %462 = vmatprep.subr.bf16.mxu0 %v461_v3  ;;  %v25_v7 = vld [vmem:[%s610_s0 + $0x8] sm:$0xff]  ;;  %v510_v8 = vmov 0.0   ;;  %vm511_vm1 = vmmov 0   ;;  %v121_v9 = vld [vmem:[%s611_s1] sm:$0xff] }
   0x5   :  { %464 = vmatpush3.bf16.msra.mxu0 %v461_v3  ;;  %444 = vmatprep.subr.mxu1 %v510_v8  ;;  %vm130_vm2 = vcmask 64512   ;;  %v414_v11 = vld [vmem:[%s611_s1 + $0x8] sm:$0xff]  ;;  %v410_v13 = vld [vmem:[%s613_s3] ss:$0 sm:$0xff]  ;;  %vm122_vm3 = vcmask 130048   ;;  %s512_s16 = smov [#allocation2]  }
   0x6   :  { %466 = vmatprep.subr.bf16.mxu0 %v465_v6  ;;  %446 = vmatprep.mubr.msk.f32.mxu1 %vm511_vm1, %v510_v8  ;;  %v131_v10 = vsel %vm130_vm2, %v121_v9, 0.0  ;;  %v220_v12 = vsel %vm130_vm2, %v414_v11, 0.0  ;;  %v300_v20 = vld [vmem:[%s614_s4] sm:$0xff]  ;;  %v301_v21 = vld [vmem:[%s614_s4 + $0x8] sm:$0xff]  ;;  %s399_s17 = sshll.u32 %s512_s16, 4  ;;  %s400_s17 = int_to_ptr.vmem [resolvable:$true] %s399_s17 }
   0x7   :  { %132 = vadd.xlane.f32.xlu0 %v131_v10  ;;  %v469_v22 = vpack.c.bf16 %v301_v21, %v300_v20  ;;  %v416_v53 = vld [vmem:[%s615_s5] ss:$0 sm:$0xff]  ;;  %s486_s18 = scalar_lea.vmem %s400_s17, 256  ;;  %p491_p1 = scmp.lt.s32.totalorder %s400_s17, %s400_s17 }
   0x8   :  { %p487_p0 = scmp.ne.s32.totalorder %s400_s17, %s486_s18  ;;  %p492_p2 = scmp.lt.s32.totalorder %s486_s18, %s486_s18 }
   0x9   :  { %468 = vmatpush3.bf16.msra.mxu0 %v465_v6 }
   0xa   :  { %p493_p3 = por %p492_p2, %p491_p1 }
   0xb   :  { %221 = vadd.xlane.f32.xlu0 %v220_v12 }
   0xc   :  { %442 = vmatmul.mubr.msk.f32.vlgmr.msra.gmra.mrb[0].mxu0 %vm37_vm0, %v25_v7  ;;  %p494_p4 = pnand %p493_p3, %p487_p0 }
  0x94   :  { %v133_v28 = vpop.xlane.xlu0 %132 }
  0x95   :  { %v134_v31 = vadd.f32 0.04, %v133_v28 }
  0x98   :  { %v222_v32 = vpop.xlane.xlu0 %221 }
  0x99   :  { %v223_v35 = vadd.f32 0.04, %v222_v32 }
  0xdf   :  { %v443_v14 = vpop.f32.mrb[0].mxu0 }
  0xe0   :  { %v110_v15 = vpop.f32.mrb[1].mxu0  ;;  %v116_v16 = vadd.f32 %v443_v14, %v410_v13 }
  0xe1   :  { %v111_v17 = vadd.f32 %v410_v13, %v110_v15 }
  0xe3   :  { %478 = vtanh.f32 %v111_v17 }
  0xe4   :  { %480 = vtanh.f32 %v116_v16 }
  0xe5   :  { %482 = vrcp.f32 %v134_v31 }
  0xe6   :  { %484 = vrcp.f32 %v223_v35 }
  0xed   :  { %v479_v18 = vpop.eup %478 }
  0xee   :  { %445 = vmatpush3.msra.mxu1 %v479_v18  ;;  %v481_v19 = vpop.eup %480  ;;  %v123_v23 = vsel %vm122_vm3, %v479_v18, 0.0 }
  0xef   :  { %447 = vmatmul.mubr.msk.f32.vlgmr.msra.gmra.mrb[0].mxu1 %vm130_vm2, %v121_v9  ;;  %449 = vmatprep.subr.mxu1 %v510_v8  ;;  %v124_v24 = vrot.slane %v123_v23, 4  ;;  %v213_v25 = vsel %vm122_vm3, %v481_v19, 0.0  ;;  %v483_v42 = vpop.eup %482 }
  0xf0   :  { %450 = vmatpush3.msra.mxu1 %v481_v19  ;;  %451 = vmatprep.mubr.msk.f32.mxu1 %vm511_vm1, %v510_v8  ;;  %v214_v27 = vrot.slane %v213_v25, 4  ;;  %v485_v48 = vpop.eup %484 }
  0xf1   :  { %470 = vmatprep.subr.bf16.mxu1 %v469_v22  ;;  %v125_v26 = vadd.f32 %v124_v24, %v123_v23 }
  0xf2   :  { %v215_v30 = vadd.f32 %v214_v27, %v213_v25 }
  0xf3   :  { %452 = vmatmul.mubr.msk.f32.vlgmr.msra.gmra.mrb[2].mxu1 %vm130_vm2, %v414_v11  ;;  %v126_v29 = vrot.slane %v125_v26, 2 }
  0xf4   :  { %472 = vmatpush3.bf16.msra.mxu1 %v469_v22  ;;  %v216_v34 = vrot.slane %v215_v30, 2 }
  0xf5   :  { %v127_v33 = vadd.f32 %v126_v29, %v125_v26 }
  0xf6   :  { %v217_v37 = vadd.f32 %v216_v34, %v215_v30 }
  0xf7   :  { %v128_v36 = vrot.slane %v127_v33, 1 }
  0xf8   :  { %v218_v39 = vrot.slane %v217_v37, 1 }
  0xf9   :  { %v129_v38 = vadd.f32 %v128_v36, %v127_v33 }
  0xfa   :  { %v219_v41 = vadd.f32 %v218_v39, %v217_v37 }
  0xfb   :  { %v136_v40 = vmul.f32 0.005, %v129_v38 }
  0xfc   :  { %v225_v47 = vmul.f32 0.005, %v219_v41 }
 0x1c2   :  { %v206_v43 = vpop.f32.mrb[0].mxu1 }
 0x1c3   :  { %v207_v44 = vadd.f32 %v206_v43, %v136_v40  ;;  %v448_v45 = vpop.f32.mrb[1].mxu1 }
 0x1c5   :  { %v210_v46 = vmul.f32 %v483_v42, %v207_v44 }
 0x1c6   :  { %v295_v49 = vpop.f32.mrb[2].mxu1 }
 0x1c7   :  { %v296_v50 = vadd.f32 %v295_v49, %v225_v47  ;;  %v453_v51 = vpop.f32.mrb[3].mxu1  ;;  %458 = vmatprep.mubr.msk.f32.mxu1 %vm122_vm3, %v210_v46 }
 0x1c9   :  { %v299_v52 = vmul.f32 %v485_v48, %v296_v50 }
 0x1cb   :  { %459 = vmatmul.mubr.msk.f32.vlgmr.msra.gmra.mrb[4].mxu1 %vm122_vm3, %v299_v52 }
 0x29e   :  { %v460_v54 = vpop.f32.mrb[4].mxu1 }
 0x29f   :  { %v387_v55 = vadd.f32 %v460_v54, %v416_v53  ;;  %v381_v56 = vpop.f32.mrb[5].mxu1 }
 0x2a0   :  { %v382_v57 = vadd.f32 %v416_v53, %v381_v56 }
 0x2a1   :  { %v391_v58 = vmax.f32 %v387_v55, 0.0 }
 0x2a2   :  { %v390_v59 = vmax.f32 %v382_v57, 0.0 }
 0x2a3   :  { %393 = vst.msk [vmem:[#allocation2 + $0x8] sm:$0xff] %vm122_vm3, %v391_v58 }
 0x2a4   :  { %392 = vst.msk [vmem:[#allocation2] sm:$0xff] %vm122_vm3, %v390_v59 }
 0x2a5   :  { %497 = shalt.err (!%p494_p4)
}
 0x2a6   :  { %s498_s20 = scalar_lea.hbm %s616_s6, 256 }
 0x2a7   :  { %p499_p5 = scmp.ne.s32.totalorder %s616_s6, %s498_s20  ;;  %p502_p6 = scmp.lt.u32.totalorder %s498_s20, %s616_s6 }
 0x2a9   :  { %p504_p7 = pnand %p502_p6, %p499_p5 }
 0x2ab   :  { %507 = shalt.err (!%p504_p7)
}
 0x2ac   :  { %s513_s25 = smov 128   ;;  %s514_s26 = smov 8  }
 0x2ad   :  { %405 = dma.vmem_to_hbm [thread:$0]  %s400_s17, 256, %s616_s6, [#allocation3], %s513_s25, %s513_s25, %s514_s26  }
 0x2ae   :  { %508 = dma.done.wait [#allocation3], 256  }
 0x2af   :  { %509 = vsyncadd [#allocation3], 4294967040 }
 0x2b0   :  { %409 = vsyncpa [#allocation3], 1 }

</bundles_post_ra>
